<compile_context>
chip_gen: v7x
topology: tpu7x:2x2x1
jax: 0.10.0
libtpu: 0.0.40
codegen_flags: <defaults>
</compile_context>

<pallas_src>
import functools

import numpy as np
import jax
import jax.numpy as jnp
from jax.experimental import pallas as pl
from jax.experimental.pallas import tpu as pltpu


# ----------------------------------------------------------------------------
# Pallas kernel: fused STAMP attention readout for a TB-session tile
# ----------------------------------------------------------------------------
def _stamp_kernel(emb_ref, mask_ref, last_ref, mean_ref,
                  w1_ref, w2_ref, w3_ref, ba_ref, wa_ref, wb_ref,
                  pred_ref):
    tb, seq_len, dim = emb_ref.shape

    emb = emb_ref[...]                                    # (TB, L, D) f32
    mask = mask_ref[...]                                  # (TB, L)    f32
    last_sel = last_ref[...]                              # (TB, L)    f32 one-hot at len-1
    mean_w = mean_ref[...]                                # (TB, L)    f32 (1/len)

    # xt = item_embedding[b, len_b - 1]; ms = sum(item_embedding, dim=1) / len_b
    # (sum over ALL positions incl. padding, exactly like the torch module).
    xt = jnp.sum(emb * last_sel[:, :, None], axis=1)      # (TB, D) f32
    ms = jnp.sum(emb * mean_w[:, :, None], axis=1)        # (TB, D) f32

    # Position-wise w1 linear on the flattened (TB*L, D) slab -> wide MXU matmul.
    emb_flat_bf = emb.reshape(tb * seq_len, dim).astype(jnp.bfloat16)
    res_mem = jnp.dot(emb_flat_bf, w1_ref[...],
                      preferred_element_type=jnp.float32).reshape(tb, seq_len, dim)
    res_last = jnp.dot(xt.astype(jnp.bfloat16), w2_ref[...],
                       preferred_element_type=jnp.float32)          # (TB, D)
    res_gi = jnp.dot(ms.astype(jnp.bfloat16), w3_ref[...],
                     preferred_element_type=jnp.float32)            # (TB, D)

    # sigmoid(w1 m_i + w2 x_t + w3 m_s)  -- f32 elementwise
    res_act = jax.nn.sigmoid(res_mem + res_last[:, None, :] + res_gi[:, None, :])

    # alpha = (res_act @ b_a) * mask   (lane-axis reduce, stays f32)
    alp = jnp.sum(res_act * ba_ref[...][None], axis=-1) * mask       # (TB, L)

    # ma = alpha-weighted sum of the sequence + general interest ms
    ma = jnp.sum(emb * alp[:, :, None], axis=1) + ms                 # (TB, D)

    hs = jnp.tanh(jnp.dot(ma.astype(jnp.bfloat16), wa_ref[...],
                          preferred_element_type=jnp.float32))       # (TB, D)
    ht = jnp.tanh(jnp.dot(xt.astype(jnp.bfloat16), wb_ref[...],
                          preferred_element_type=jnp.float32))       # (TB, D)

    pred_ref[...] = hs * ht                                          # (TB, D) f32


# ----------------------------------------------------------------------------
# pallas_call wrapper
# ----------------------------------------------------------------------------
def _pick_tb(batch):
    # Whole batch per step when small; otherwise an 8-aligned tile that divides B.
    if batch <= 256:
        return batch
    for tb in (256, 128, 64, 32, 16, 8):
        if batch % tb == 0:
            return tb
    return batch


def run_stamp(emb, mask, last_sel, mean_w, params):
    B, L, D = emb.shape
    TB = _pick_tb(B)
    grid = (B // TB,)

    to_bf = lambda w: w.T.astype(jnp.bfloat16)   # nn.Linear: y = x @ W.T
    args = (
        emb.astype(jnp.float32),
        mask.astype(jnp.float32),
        last_sel.astype(jnp.float32),
        mean_w.astype(jnp.float32),
        to_bf(params['w1']), to_bf(params['w2']), to_bf(params['w3']),
        params['b_a'].reshape(1, D).astype(jnp.float32),
        to_bf(params['mlp_a']), to_bf(params['mlp_b']),
    )

    wspec = lambda shape: pl.BlockSpec(shape, lambda b: (0, 0))
    in_specs = [
        pl.BlockSpec((TB, L, D), lambda b: (b, 0, 0)),   # emb
        pl.BlockSpec((TB, L), lambda b: (b, 0)),         # mask
        pl.BlockSpec((TB, L), lambda b: (b, 0)),         # last-item one-hot
        pl.BlockSpec((TB, L), lambda b: (b, 0)),         # 1/len mean weights
        wspec((D, D)), wspec((D, D)), wspec((D, D)),     # w1, w2, w3
        wspec((1, D)),                                   # b_a
        wspec((D, D)), wspec((D, D)),                    # mlp_a, mlp_b
    ]

    return pl.pallas_call(
        _stamp_kernel,
        grid=grid,
        in_specs=in_specs,
        out_specs=pl.BlockSpec((TB, D), lambda b: (b, 0)),
        out_shape=jax.ShapeDtypeStruct((B, D), jnp.float32),
        compiler_params=pltpu.CompilerParams(dimension_semantics=("parallel",)),
    )(*args)


# ----------------------------------------------------------------------------
# Full STAMP forward (host/XLA glue + fused Pallas kernel)
# ----------------------------------------------------------------------------
@jax.jit
def stamp_forward(params, seqs, lengths):
    B, L = seqs.shape
    lengths = lengths.astype(jnp.int32)

    item_embedding = jnp.take(params['emb'], seqs, axis=0)            # (B, L, D)
    mask = (seqs != 0).astype(jnp.float32)                            # (B, L)

    pos = jnp.arange(L, dtype=jnp.int32)[None, :]
    last_sel = (pos == (lengths - 1)[:, None]).astype(jnp.float32)    # (B, L)
    mean_w = jnp.broadcast_to(1.0 / lengths.astype(jnp.float32)[:, None], (B, L))

    predictions = run_stamp(item_embedding, mask, last_sel, mean_w, params)
    return item_embedding, predictions                                 # (xi, predictions)


# Pure-JAX f32 reference (mirrors the PyTorch forward) for validation.
def stamp_reference(params, seqs, lengths):
    lengths = lengths.astype(jnp.int32)
    emb = jnp.take(params['emb'], seqs, axis=0)
    B, L, D = emb.shape
    mask = (seqs != 0).astype(jnp.float32)
    xt = emb[jnp.arange(B), lengths - 1]                               # get_last_item
    ms = jnp.sum(emb, axis=1) / lengths.astype(jnp.float32)[:, None]
    res = (emb @ params['w1'].T
           + (xt @ params['w2'].T)[:, None, :]
           + (ms @ params['w3'].T)[:, None, :])
    res_act = jax.nn.sigmoid(res)
    alp = jnp.einsum('bld,d->bl', res_act, params['b_a']) * mask
    ma = jnp.einsum('bl,bld->bd', alp, emb) + ms
    hs = jnp.tanh(ma @ params['mlp_a'].T)
    ht = jnp.tanh(xt @ params['mlp_b'].T)
    return emb, hs * ht


# ----------------------------------------------------------------------------
# Parameter init (matching _init_weights: Embedding N(0,0.002), Linear N(0,0.05),
# b_a N(0,0.05), biases absent/zero)
# ----------------------------------------------------------------------------
def init_params(key, n_items, dim):
    ks = jax.random.split(key, 8)
    n = lambda k, shape, std: std * jax.random.normal(k, shape, jnp.float32)
    return {
        'emb':   n(ks[0], (n_items, dim), 0.002),
        'w1':    n(ks[1], (dim, dim), 0.05),
        'w2':    n(ks[2], (dim, dim), 0.05),
        'w3':    n(ks[3], (dim, dim), 0.05),
        'w0':    n(ks[4], (1, dim), 0.05),      # defined in module, unused in forward
        'b_a':   n(ks[5], (dim,), 0.05),
        'mlp_a': n(ks[6], (dim, dim), 0.05),
        'mlp_b': n(ks[7], (dim, dim), 0.05),
    }


if __name__ == "__main__":
    B, L, D = 2, 8, 32
    n_items = 50

    key = jax.random.PRNGKey(0)
    pkey, skey = jax.random.split(key)
    params = init_params(pkey, n_items, D)

    # Deterministic sessions: random item ids, right-padded with 0.
    lengths = jnp.array([5, 4], dtype=jnp.int32)
    raw = jax.random.randint(skey, (B, L), 1, n_items)
    pos = jnp.arange(L, dtype=jnp.int32)[None, :]
    seqs = jnp.where(pos < lengths[:, None], raw, 0)

    xi, preds = stamp_forward(params, seqs, lengths)
    xi_ref, preds_ref = stamp_reference(params, seqs, lengths)
    jax.block_until_ready((xi, preds))

    assert xi.shape == (B, L, D) and preds.shape == (B, D)
    assert bool(jnp.all(jnp.isfinite(preds))) and bool(jnp.all(jnp.isfinite(xi)))

    # bf16-matmul kernel vs f32 reference: normalized max-error check.
    scale = float(jnp.max(jnp.abs(preds_ref))) + 1e-12
    err = float(jnp.max(jnp.abs(preds - preds_ref))) / scale
    assert err < 5e-2, f"kernel vs reference mismatch: {err}"

    print("KERNEL_OK")
</pallas_src>

<mosaic_0001>
module attributes {stable_mosaic.version = 11 : i64} {
  func.func @_stamp_kernel(%arg0: i32, %arg1: memref<2x8x32xf32, #tpu.memory_space<vmem>>, %arg2: memref<2x8xf32, #tpu.memory_space<vmem>>, %arg3: memref<2x8xf32, #tpu.memory_space<vmem>>, %arg4: memref<2x8xf32, #tpu.memory_space<vmem>>, %arg5: memref<32x32xbf16, #tpu.memory_space<vmem>>, %arg6: memref<32x32xbf16, #tpu.memory_space<vmem>>, %arg7: memref<32x32xbf16, #tpu.memory_space<vmem>>, %arg8: memref<1x32xf32, #tpu.memory_space<vmem>>, %arg9: memref<32x32xbf16, #tpu.memory_space<vmem>>, %arg10: memref<32x32xbf16, #tpu.memory_space<vmem>>, %arg11: memref<2x32xf32, #tpu.memory_space<vmem>>) attributes {dimension_semantics = [#tpu.dimension_semantics<parallel>], iteration_bounds = array<i64: 1>, scalar_prefetch = 0 : i64, scratch_operands = 0 : i64, tpu.core_type = #tpu.core_type<tc>, window_params = [{transform_indices = @transform_0, window_bounds = array<i64: 2, 8, 32>}, {transform_indices = @transform_1, window_bounds = array<i64: 2, 8>}, {transform_indices = @transform_2, window_bounds = array<i64: 2, 8>}, {transform_indices = @transform_3, window_bounds = array<i64: 2, 8>}, {pipeline_mode = #tpu.pipeline_mode<synchronous>, transform_indices = @transform_4, window_bounds = array<i64: 32, 32>}, {pipeline_mode = #tpu.pipeline_mode<synchronous>, transform_indices = @transform_5, window_bounds = array<i64: 32, 32>}, {pipeline_mode = #tpu.pipeline_mode<synchronous>, transform_indices = @transform_6, window_bounds = array<i64: 32, 32>}, {pipeline_mode = #tpu.pipeline_mode<synchronous>, transform_indices = @transform_7, window_bounds = array<i64: 1, 32>}, {pipeline_mode = #tpu.pipeline_mode<synchronous>, transform_indices = @transform_8, window_bounds = array<i64: 32, 32>}, {pipeline_mode = #tpu.pipeline_mode<synchronous>, transform_indices = @transform_9, window_bounds = array<i64: 32, 32>}, {transform_indices = @transform_10, window_bounds = array<i64: 2, 32>}]} {
    %c0 = arith.constant 0 : index
    %c0_0 = arith.constant 0 : index
    %c0_1 = arith.constant 0 : index
    %0 = vector.load %arg1[%c0, %c0_0, %c0_1] : memref<2x8x32xf32, #tpu.memory_space<vmem>>, vector<2x8x32xf32>
    %c0_2 = arith.constant 0 : index
    %c0_3 = arith.constant 0 : index
    %1 = vector.load %arg2[%c0_2, %c0_3] : memref<2x8xf32, #tpu.memory_space<vmem>>, vector<2x8xf32>
    %c0_4 = arith.constant 0 : index
    %c0_5 = arith.constant 0 : index
    %2 = vector.load %arg3[%c0_4, %c0_5] : memref<2x8xf32, #tpu.memory_space<vmem>>, vector<2x8xf32>
    %c0_6 = arith.constant 0 : index
    %c0_7 = arith.constant 0 : index
    %3 = vector.load %arg4[%c0_6, %c0_7] : memref<2x8xf32, #tpu.memory_space<vmem>>, vector<2x8xf32>
    %4 = vector.shape_cast %2 : vector<2x8xf32> to vector<2x8x1xf32>
    %5 = vector.broadcast %4 : vector<2x8x1xf32> to vector<2x8x32xf32>
    %6 = arith.mulf %0, %5 : vector<2x8x32xf32>
    %cst = arith.constant dense<0.000000e+00> : vector<2x32xf32>
    %7 = vector.multi_reduction <add>, %6, %cst [1] : vector<2x8x32xf32> to vector<2x32xf32>
    %8 = vector.shape_cast %3 : vector<2x8xf32> to vector<2x8x1xf32>
    %9 = vector.broadcast %8 : vector<2x8x1xf32> to vector<2x8x32xf32>
    %10 = arith.mulf %0, %9 : vector<2x8x32xf32>
    %cst_8 = arith.constant dense<0.000000e+00> : vector<2x32xf32>
    %11 = vector.multi_reduction <add>, %10, %cst_8 [1] : vector<2x8x32xf32> to vector<2x32xf32>
    %12 = vector.shape_cast %0 : vector<2x8x32xf32> to vector<16x32xf32>
    %13 = arith.truncf %12 : vector<16x32xf32> to vector<16x32xbf16>
    %c0_9 = arith.constant 0 : index
    %c0_10 = arith.constant 0 : index
    %14 = vector.load %arg5[%c0_9, %c0_10] : memref<32x32xbf16, #tpu.memory_space<vmem>>, vector<32x32xbf16>
    %cst_11 = arith.constant dense<0.000000e+00> : vector<16x32xf32>
    %15 = tpu.matmul %13, %14, %cst_11 {dimension_numbers = #tpu.dot_dimension_numbers<[1], [0], [0], [1], [0, 0, 1, 1], [], []>} : vector<16x32xbf16>, vector<32x32xbf16>, vector<16x32xf32> -> vector<16x32xf32>
    %16 = vector.shape_cast %15 : vector<16x32xf32> to vector<2x8x32xf32>
    %17 = arith.truncf %7 : vector<2x32xf32> to vector<2x32xbf16>
    %c0_12 = arith.constant 0 : index
    %c0_13 = arith.constant 0 : index
    %18 = vector.load %arg6[%c0_12, %c0_13] : memref<32x32xbf16, #tpu.memory_space<vmem>>, vector<32x32xbf16>
    %cst_14 = arith.constant dense<0.000000e+00> : vector<2x32xf32>
    %19 = tpu.matmul %17, %18, %cst_14 {dimension_numbers = #tpu.dot_dimension_numbers<[1], [0], [0], [1], [0, 0, 1, 1], [], []>} : vector<2x32xbf16>, vector<32x32xbf16>, vector<2x32xf32> -> vector<2x32xf32>
    %20 = arith.truncf %11 : vector<2x32xf32> to vector<2x32xbf16>
    %c0_15 = arith.constant 0 : index
    %c0_16 = arith.constant 0 : index
    %21 = vector.load %arg7[%c0_15, %c0_16] : memref<32x32xbf16, #tpu.memory_space<vmem>>, vector<32x32xbf16>
    %cst_17 = arith.constant dense<0.000000e+00> : vector<2x32xf32>
    %22 = tpu.matmul %20, %21, %cst_17 {dimension_numbers = #tpu.dot_dimension_numbers<[1], [0], [0], [1], [0, 0, 1, 1], [], []>} : vector<2x32xbf16>, vector<32x32xbf16>, vector<2x32xf32> -> vector<2x32xf32>
    %23 = vector.shape_cast %19 : vector<2x32xf32> to vector<2x1x32xf32>
    %24 = vector.broadcast %23 : vector<2x1x32xf32> to vector<2x8x32xf32>
    %25 = arith.addf %16, %24 : vector<2x8x32xf32>
    %26 = vector.shape_cast %22 : vector<2x32xf32> to vector<2x1x32xf32>
    %27 = vector.broadcast %26 : vector<2x1x32xf32> to vector<2x8x32xf32>
    %28 = arith.addf %25, %27 : vector<2x8x32xf32>
    %29 = arith.negf %28 : vector<2x8x32xf32>
    %30 = math.exp %29 : vector<2x8x32xf32>
    %cst_18 = arith.constant 1.000000e+00 : f32
    %31 = vector.broadcast %cst_18 : f32 to vector<2x8x32xf32>
    %32 = arith.addf %31, %30 : vector<2x8x32xf32>
    %33 = arith.divf %31, %32 : vector<2x8x32xf32>
    %c0_19 = arith.constant 0 : index
    %c0_20 = arith.constant 0 : index
    %34 = vector.load %arg8[%c0_19, %c0_20] : memref<1x32xf32, #tpu.memory_space<vmem>>, vector<1x32xf32>
    %35 = vector.shape_cast %34 : vector<1x32xf32> to vector<1x1x32xf32>
    %36 = vector.broadcast %35 : vector<1x1x32xf32> to vector<2x8x32xf32>
    %37 = arith.mulf %33, %36 : vector<2x8x32xf32>
    %cst_21 = arith.constant dense<0.000000e+00> : vector<2x8xf32>
    %38 = vector.multi_reduction <add>, %37, %cst_21 [2] : vector<2x8x32xf32> to vector<2x8xf32>
    %39 = arith.mulf %38, %1 : vector<2x8xf32>
    %40 = vector.shape_cast %39 : vector<2x8xf32> to vector<2x8x1xf32>
    %41 = vector.broadcast %40 : vector<2x8x1xf32> to vector<2x8x32xf32>
    %42 = arith.mulf %0, %41 : vector<2x8x32xf32>
    %cst_22 = arith.constant dense<0.000000e+00> : vector<2x32xf32>
    %43 = vector.multi_reduction <add>, %42, %cst_22 [1] : vector<2x8x32xf32> to vector<2x32xf32>
    %44 = arith.addf %43, %11 : vector<2x32xf32>
    %45 = arith.truncf %44 : vector<2x32xf32> to vector<2x32xbf16>
    %c0_23 = arith.constant 0 : index
    %c0_24 = arith.constant 0 : index
    %46 = vector.load %arg9[%c0_23, %c0_24] : memref<32x32xbf16, #tpu.memory_space<vmem>>, vector<32x32xbf16>
    %cst_25 = arith.constant dense<0.000000e+00> : vector<2x32xf32>
    %47 = tpu.matmul %45, %46, %cst_25 {dimension_numbers = #tpu.dot_dimension_numbers<[1], [0], [0], [1], [0, 0, 1, 1], [], []>} : vector<2x32xbf16>, vector<32x32xbf16>, vector<2x32xf32> -> vector<2x32xf32>
    %48 = math.tanh %47 : vector<2x32xf32>
    %49 = arith.truncf %7 : vector<2x32xf32> to vector<2x32xbf16>
    %c0_26 = arith.constant 0 : index
    %c0_27 = arith.constant 0 : index
    %50 = vector.load %arg10[%c0_26, %c0_27] : memref<32x32xbf16, #tpu.memory_space<vmem>>, vector<32x32xbf16>
    %cst_28 = arith.constant dense<0.000000e+00> : vector<2x32xf32>
    %51 = tpu.matmul %49, %50, %cst_28 {dimension_numbers = #tpu.dot_dimension_numbers<[1], [0], [0], [1], [0, 0, 1, 1], [], []>} : vector<2x32xbf16>, vector<32x32xbf16>, vector<2x32xf32> -> vector<2x32xf32>
    %52 = math.tanh %51 : vector<2x32xf32>
    %53 = arith.mulf %48, %52 : vector<2x32xf32>
    %c0_29 = arith.constant 0 : index
    %c0_30 = arith.constant 0 : index
    %54 = vector.load %arg11[%c0_29, %c0_30] : memref<2x32xf32, #tpu.memory_space<vmem>>, vector<2x32xf32>
    tpu.vector_store %arg11[%c0_29, %c0_30], %53 {strides = array<i32>} : memref<2x32xf32, #tpu.memory_space<vmem>>, vector<2x32xf32>,
    return
  }
  func.func @transform_0(%arg0: i32) -> (i32, i32, i32) {
    %c0_i32 = arith.constant 0 : i32
    %c0_i32_0 = arith.constant 0 : i32
    %c0_i32_1 = arith.constant 0 : i32
    return %arg0, %c0_i32, %c0_i32_0 : i32, i32, i32
  }
  func.func @transform_1(%arg0: i32) -> (i32, i32) {
    %c0_i32 = arith.constant 0 : i32
    %c0_i32_0 = arith.constant 0 : i32
    return %arg0, %c0_i32 : i32, i32
  }
  func.func @transform_2(%arg0: i32) -> (i32, i32) {
    %c0_i32 = arith.constant 0 : i32
    %c0_i32_0 = arith.constant 0 : i32
    return %arg0, %c0_i32 : i32, i32
  }
  func.func @transform_3(%arg0: i32) -> (i32, i32) {
    %c0_i32 = arith.constant 0 : i32
    %c0_i32_0 = arith.constant 0 : i32
    return %arg0, %c0_i32 : i32, i32
  }
  func.func @transform_4(%arg0: i32) -> (i32, i32) {
    %c0_i32 = arith.constant 0 : i32
    %c0_i32_0 = arith.constant 0 : i32
    %c0_i32_1 = arith.constant 0 : i32
    return %c0_i32, %c0_i32_0 : i32, i32
  }
  func.func @transform_5(%arg0: i32) -> (i32, i32) {
    %c0_i32 = arith.constant 0 : i32
    %c0_i32_0 = arith.constant 0 : i32
    %c0_i32_1 = arith.constant 0 : i32
    return %c0_i32, %c0_i32_0 : i32, i32
  }
  func.func @transform_6(%arg0: i32) -> (i32, i32) {
    %c0_i32 = arith.constant 0 : i32
    %c0_i32_0 = arith.constant 0 : i32
    %c0_i32_1 = arith.constant 0 : i32
    return %c0_i32, %c0_i32_0 : i32, i32
  }
  func.func @transform_7(%arg0: i32) -> (i32, i32) {
    %c0_i32 = arith.constant 0 : i32
    %c0_i32_0 = arith.constant 0 : i32
    %c0_i32_1 = arith.constant 0 : i32
    return %c0_i32, %c0_i32_0 : i32, i32
  }
  func.func @transform_8(%arg0: i32) -> (i32, i32) {
    %c0_i32 = arith.constant 0 : i32
    %c0_i32_0 = arith.constant 0 : i32
    %c0_i32_1 = arith.constant 0 : i32
    return %c0_i32, %c0_i32_0 : i32, i32
  }
  func.func @transform_9(%arg0: i32) -> (i32, i32) {
    %c0_i32 = arith.constant 0 : i32
    %c0_i32_0 = arith.constant 0 : i32
    %c0_i32_1 = arith.constant 0 : i32
    return %c0_i32, %c0_i32_0 : i32, i32
  }
  func.func @transform_10(%arg0: i32) -> (i32, i32) {
    %c0_i32 = arith.constant 0 : i32
    %c0_i32_0 = arith.constant 0 : i32
    return %arg0, %c0_i32 : i32, i32
  }
}

</mosaic_0001>

<bundles_post_ra>
// kernel: stamp_forward.1
= control target key start
LH: loop header
LB: loop body
LE: loop exit
PB: predicated region body
PF: predicated region fallthrough
CT: control target
= control target key end

     0   :  { %v42_v0 = vlaneseq  ;;  %v711_v7 = vmov 0.0   ;;  %s911_s0 = inlined_call_operand.vmem [shape: f32[2,8,32], index: 0, kind: input, shape index: {}]   ;;  %s912_s1 = inlined_call_operand.vmem [shape: f32[2,8], index: 1, kind: input, shape index: {}]   ;;  %s913_s2 = inlined_call_operand.vmem [shape: f32[2,8], index: 2, kind: input, shape index: {}]   ;;  %s914_s3 = inlined_call_operand.vmem [shape: f32[2,8], index: 3, kind: input, shape index: {}]   ;;  %s915_s4 = inlined_call_operand.vmem [shape: bf16[32,32], index: 4, kind: input, shape index: {}]   ;;  %s916_s5 = inlined_call_operand.vmem [shape: bf16[32,32], index: 5, kind: input, shape index: {}]   ;;  %s917_s6 = inlined_call_operand.vmem [shape: bf16[32,32], index: 6, kind: input, shape index: {}]   ;;  %s918_s7 = inlined_call_operand.vmem [shape: f32[1,32], index: 7, kind: input, shape index: {}]   ;;  %s919_s8 = inlined_call_operand.vmem [shape: bf16[32,32], index: 8, kind: input, shape index: {}]   ;;  %s920_s9 = inlined_call_operand.vmem [shape: bf16[32,32], index: 9, kind: input, shape index: {}]   ;;  %s921_s10 = inlined_call_operand.hbm [shape: f32[2,32], index: 10, kind: output, shape index: {}]  }
   0x1   :  { %v41_v1 = vld [vmem:[%s914_s3] sm:$0x3]  ;;  %618 = vmatprep.subr.bf16.mxu0 %v711_v7  ;;  %626 = vmatprep.subr.bf16.mxu1 %v711_v7  ;;  %v801_v11 = vld [vmem:[%s911_s0 + $0x8] sm:$0xff] }
   0x2   :  { %v40_v2 = vld [vmem:[%s913_s2] sm:$0x3]  ;;  %v777_v3 = vshrl.u32 %v42_v0, 7  ;;  %v666_v12 = vld [vmem:[%s915_s4 + $0x8] sm:$0xff]  }
   0x3   :  { %v665_v4 = vld [vmem:[%s915_s4] sm:$0xff]  }
   0x4   :  { %v783_v5 = vsub.s32 0, %v777_v3  ;;  %v786_v6 = vsub.s32 1, %v777_v3  ;;  %619 = vmatpush3.bf16.msra.mxu0 %v665_v4  ;;  %v796_v10 = vld [vmem:[%s911_s0] sm:$0xff] }
   0x5   :  { %620 = vmatprep.subr.bf16.mxu0 %v711_v7 }
   0x6   :  { %v76_v8 = vrot.slane %v41_v1, %v783_v5  ;;  %v45_v9 = vrot.slane %v40_v2, %v783_v5  ;;  %v83_v13 = vrot.slane %v41_v1, %v786_v6  ;;  %v52_v14 = vrot.slane %v40_v2, %v786_v6 }
   0x8   :  { %78 = vbcast.lane.b32.xlu1 %v76_v8, 256  ;;  %47 = vbcast.lane.b32.xlu0 %v45_v9, 256 }
   0x9   :  { %621 = vmatpush3.bf16.msra.mxu0 %v666_v12 }
   0xa   :  { %15 = vsyncpa [#allocation3], 0  ;;  %v103_v15 = vpack.c.bf16 %v801_v11, %v796_v10  ;;  %634 = vmatprep.subr.bf16.mxu0 %v711_v7  ;;  %vm712_vm0 = vmmov 0   ;;  %vm58_vm1 = vcmask 261120   ;;  %v667_v16 = vld [vmem:[%s916_s5] sm:$0xff]   ;;  %v669_v18 = vld [vmem:[%s916_s5 + $0x8] sm:$0xff]  }
   0xb   :  { %622 = vmatprep.mubr.msk.bf16.mxu0 %vm712_vm0, %v711_v7  ;;  %630 = vmatprep.mubr.msk.bf16.mxu1 %vm712_vm0, %v711_v7  ;;  %v668_v17 = vld [vmem:[%s917_s6] sm:$0xff]   ;;  %v670_v19 = vld [vmem:[%s917_s6 + $0x8] sm:$0xff]   ;;  %vm174_vm2 = vcmask 1041409   ;;  %vm569_vm3 = vcmask 254976  }
   0xc   :  { %85 = vbcast.lane.b32.xlu1 %v83_v13, 256  ;;  %54 = vbcast.lane.b32.xlu0 %v52_v14, 256  ;;  %v671_v2 = vld [vmem:[%s920_s9] sm:$0xff]   ;;  %v672_v9 = vld [vmem:[%s920_s9 + $0x8] sm:$0xff]  }
   0xd   :  { %623 = vmatmul.mubr.msk.bf16.vlgmr.msra.gmra.mrb[0].mxu0 %vm58_vm1, %v103_v15  ;;  %627 = vmatpush3.bf16.msra.mxu1 %v667_v16  ;;  %v713_v16 = vmov 1966171168  }
   0xe   :  { %635 = vmatpush3.bf16.msra.mxu0 %v668_v17  ;;  %628 = vmatprep.subr.bf16.mxu1 %v711_v7  ;;  %v301_v17 = vunpack.c.l.s4 %v713_v16 }
   0xf   :  { %636 = vmatprep.subr.bf16.mxu0 %v711_v7  ;;  %638 = vmatprep.mubr.msk.bf16.mxu0 %vm712_vm0, %v711_v7 }
  0x11   :  { %629 = vmatpush3.bf16.msra.mxu1 %v669_v18  ;;  %v302_v18 = vunpack.c.0.s8 %v301_v17 }
  0x12   :  { %637 = vmatpush3.bf16.msra.mxu0 %v670_v19  ;;  %642 = vmatprep.subr.bf16.mxu1 %v711_v7 }
  0x13   :  { %650 = vmatprep.subr.bf16.mxu0 %v711_v7  ;;  %v305_v19 = vsub.s32 %v302_v18, %v777_v3 }
  0x7a   :  { %v79_v20 = vpop.permute.xlu1 %78  ;;  %v48_v21 = vpop.permute.xlu0 %47 }
  0x7b   :  { %v87_v22 = vmul.f32 %v79_v20, %v796_v10  ;;  %v56_v23 = vmul.f32 %v48_v21, %v796_v10 }
  0x7d   :  { %v89_v24 = vsel %vm58_vm1, %v87_v22, 0.0  ;;  %v59_v25 = vsel %vm58_vm1, %v56_v23, 0.0 }
  0x7e   :  { %v90_v26 = vrot.slane %v89_v24, 4  ;;  %v60_v27 = vrot.slane %v59_v25, 4  ;;  %v86_v28 = vpop.permute.xlu1 %85  ;;  %v55_v29 = vpop.permute.xlu0 %54 }
  0x7f   :  { %v88_v30 = vmul.f32 %v86_v28, %v801_v11  ;;  %v57_v31 = vmul.f32 %v55_v29, %v801_v11 }
  0x80   :  { %v91_v32 = vadd.f32 %v90_v26, %v89_v24  ;;  %v61_v33 = vadd.f32 %v60_v27, %v59_v25 }
  0x81   :  { %v96_v34 = vsel %vm58_vm1, %v88_v30, 0.0  ;;  %v66_v35 = vsel %vm58_vm1, %v57_v31, 0.0 }
  0x82   :  { %v92_v36 = vrot.slane %v91_v32, 2  ;;  %v62_v37 = vrot.slane %v61_v33, 2  ;;  %v97_v38 = vrot.slane %v96_v34, 4  ;;  %v67_v39 = vrot.slane %v66_v35, 4 }
  0x84   :  { %v93_v40 = vadd.f32 %v92_v36, %v91_v32  ;;  %v63_v41 = vadd.f32 %v62_v37, %v61_v33  ;;  %v98_v42 = vadd.f32 %v97_v38, %v96_v34  ;;  %v68_v43 = vadd.f32 %v67_v39, %v66_v35 }
  0x86   :  { %v94_v44 = vrot.slane %v93_v40, 1  ;;  %v64_v45 = vrot.slane %v63_v41, 1  ;;  %v99_v46 = vrot.slane %v98_v42, 2  ;;  %v69_v47 = vrot.slane %v68_v43, 2 }
  0x88   :  { %v842_v48 = vadd.f32 %v94_v44, %v93_v40  ;;  %v65_v49 = vadd.f32 %v64_v45, %v63_v41  ;;  %v100_v50 = vadd.f32 %v99_v46, %v98_v42  ;;  %v70_v51 = vadd.f32 %v69_v47, %v68_v43 }
  0x8a   :  { %v101_v52 = vrot.slane %v100_v50, 1  ;;  %v71_v53 = vrot.slane %v70_v51, 1  ;;  %v232_v54 = vpack.c.bf16 %v842_v48, %v842_v48  ;;  %v164_v55 = vpack.c.bf16 %v65_v49, %v65_v49 }
  0x8c   :  { %v846_v56 = vadd.f32 %v101_v52, %v100_v50  ;;  %v72_v57 = vadd.f32 %v71_v53, %v70_v51  ;;  %v240_v60 = vunpack.c.l.b16 %v232_v54  ;;  %v172_v61 = vunpack.c.l.b16 %v164_v55  ;;  %v596_v54 = vld [vmem:[%s918_s7] ss:$0 sm:$0xff] }
  0x8e   :  { %v233_v58 = vpack.c.bf16 %v846_v56, %v846_v56  ;;  %v165_v59 = vpack.c.bf16 %v72_v57, %v72_v57 }
  0x90   :  { %v241_v62 = vunpack.c.l.b16 %v233_v58  ;;  %v173_v63 = vunpack.c.l.b16 %v165_v59 }
  0x92   :  { %v175_v0 = vsel %vm174_vm2, %v173_v63, %v172_v61  ;;  %v242_v1 = vsel %vm174_vm2, %v241_v62, %v240_v60  ;;  %v39_v62 = vld [vmem:[%s912_s1] sm:$0x3] }
  0x93   :  { %v176_v4 = vpack.c.b16 %v175_v0, %v175_v0  ;;  %v243_v8 = vpack.c.b16 %v242_v1, %v242_v1  ;;  %v407_v63 = vrot.slane %v39_v62, %v786_v6  ;;  %v400_v0 = vrot.slane %v39_v62, %v783_v5 }
  0x94   :  { %v714_v1 = vmov 0  }
  0x95   :  { %631 = vmatmul.mubr.msk.bf16.vlgmr.msra.gmra.mrb[0].mxu1 %vm58_vm1, %v176_v4  ;;  %639 = vmatmul.mubr.msk.bf16.vlgmr.msra.gmra.mrb[4].mxu0 %vm58_vm1, %v243_v8 }
  0x96   :  { %651 = vmatpush3.bf16.msra.mxu0 %v671_v2  ;;  %654 = vmatprep.mubr.msk.bf16.mxu0 %vm712_vm0, %v711_v7 }
  0x97   :  { %652 = vmatprep.subr.bf16.mxu0 %v711_v7  ;;  %646 = vmatprep.mubr.msk.bf16.mxu1 %vm712_vm0, %v711_v7 }
  0x98   :  { %663 = vset.pattern.permute.xlu0 %v714_v1  ;;  %664 = vset.pattern.permute.xlu1 %v714_v1 }
  0x9a   :  { %653 = vmatpush3.bf16.msra.mxu0 %v672_v9 }
  0x9d   :  { %655 = vmatmul.mubr.msk.bf16.vlgmr.msra.gmra.mrb[8].mxu0 %vm58_vm1, %v176_v4 }
  0xe0   :  { %v157_v12 = vpop.f32.mrb[0].mxu0 }
  0xe1   :  { %v624_v13 = vpop.f32.mrb[1].mxu0 }
  0xe2   :  { %v160_v14 = vpop.f32.mrb[2].mxu0 }
  0xe3   :  { %v625_v15 = vpop.f32.mrb[3].mxu0 }
 0x168   :  { %v226_v20 = vpop.f32.mrb[0].mxu1  ;;  %v293_v21 = vpop.f32.mrb[4].mxu0 }
 0x169   :  { %v306_v22 = vrot.slane %v226_v20, %v305_v19  ;;  %v341_v23 = vrot.slane %v293_v21, %v305_v19  ;;  %v632_v24 = vpop.f32.mrb[1].mxu1  ;;  %v640_v25 = vpop.f32.mrb[5].mxu0 }
 0x16a   :  { %v229_v26 = vpop.f32.mrb[2].mxu1  ;;  %v296_v27 = vpop.f32.mrb[6].mxu0 }
 0x16b   :  { %v307_v28 = vcombine.high %v306_v22, %v306_v22  ;;  %v314_v29 = vrot.slane %v306_v22, %v305_v19  ;;  %v342_v30 = vcombine.high %v341_v23, %v341_v23  ;;  %v349_v31 = vrot.slane %v341_v23, %v305_v19  ;;  %v633_v32 = vpop.f32.mrb[3].mxu1  ;;  %v641_v33 = vpop.f32.mrb[7].mxu0 }
 0x16d   :  { %v321_v34 = vrot.slane %v307_v28, %v305_v19  ;;  %v325_v35 = vrot.slane %v314_v29, %v783_v5  ;;  %v356_v36 = vrot.slane %v342_v30, %v305_v19  ;;  %v360_v38 = vrot.slane %v349_v31, %v783_v5 }
 0x16f   :  { %v329_v3 = vrot.slane %v321_v34, %v783_v5  ;;  %v332_v37 = vadd.f32 %v325_v35, %v157_v12  ;;  %v364_v41 = vrot.slane %v356_v36, %v783_v5  ;;  %v674_v5 = vld [vmem:[%s919_s8 + $0x8] sm:$0xff]  }
 0x170   :  { %v870_v39 = vpop.f32.mrb[8].mxu0 }
 0x171   :  { %v333_v40 = vadd.f32 %v329_v3, %v160_v14  ;;  %v367_v42 = vadd.f32 %v360_v38, %v332_v37  ;;  %v656_v43 = vpop.f32.mrb[9].mxu0  ;;  %v673_v14 = vld [vmem:[%s919_s8] sm:$0xff]   ;;  %s715_s8 = smov [#allocation2]  }
 0x172   :  { %v564_v44 = vpop.f32.mrb[10].mxu0  ;;  %643 = vmatpush3.bf16.msra.mxu1 %v673_v14  ;;  %s577_s16 = sshll.u32 %s715_s8, 4  ;;  %s578_s16 = int_to_ptr.vmem [resolvable:$true] %s577_s16 }
 0x173   :  { %v368_v45 = vadd.f32 %v364_v41, %v333_v40  ;;  %v594_v46 = vmul.f32 -1.442695, %v367_v42  ;;  %v657_v47 = vpop.f32.mrb[11].mxu0  ;;  %644 = vmatprep.subr.bf16.mxu1 %v711_v7  ;;  %s687_s17 = scalar_lea.vmem %s578_s16, 32  ;;  %p692_p1 = scmp.lt.s32.totalorder %s578_s16, %s578_s16 }
 0x174   :  { %p688_p0 = scmp.ne.s32.totalorder %s578_s16, %s687_s17  ;;  %p693_p2 = scmp.lt.s32.totalorder %s687_s17, %s687_s17 }
 0x175   :  { %675 = vpow2.f32 %v594_v46  ;;  %v595_v49 = vmul.f32 -1.442695, %v368_v45 }
 0x176   :  { %645 = vmatpush3.bf16.msra.mxu1 %v674_v5  ;;  %p694_p3 = por %p693_p2, %p692_p1 }
 0x177   :  { %677 = vpow2.f32 %v595_v49 }
 0x178   :  { %p695_p4 = pnand %p694_p3, %p688_p0 }
 0x17f   :  { %v676_v50 = vpop.eup %675 }
 0x180   :  { %v375_v51 = vadd.f32 1.0, %v676_v50 }
 0x181   :  { %v678_v52 = vpop.eup %677 }
 0x182   :  { %v376_v53 = vadd.f32 1.0, %v678_v52  ;;  %679 = vrcp.f32 %v375_v51 }
 0x184   :  { %681 = vrcp.f32 %v376_v53 }
 0x185   :  { %683 = vtanh.f32 %v870_v39 }
 0x18c   :  { %v680_v55 = vpop.eup %679 }
 0x18d   :  { %v388_v57 = vmul.f32 %v680_v55, %v596_v54 }
 0x18e   :  { %v682_v58 = vpop.eup %681 }
 0x18f   :  { %v390_v59 = vsel %vm58_vm1, %v388_v57, 0.0  ;;  %v389_v60 = vmul.f32 %v682_v58, %v596_v54 }
 0x190   :  { %391 = vadd.xlane.f32.xlu0 %v390_v59 }
 0x191   :  { %v393_v61 = vsel %vm58_vm1, %v389_v60, 0.0 }
 0x192   :  { %394 = vadd.xlane.f32.xlu1 %v393_v61 }
 0x1a3   :  { %409 = vbcast.lane.b32.xlu1 %v407_v63, 256 }
 0x1a6   :  { %402 = vbcast.lane.b32.xlu0 %v400_v0, 256 }
 0x21d   :  { %v392_v2 = vpop.xlane.xlu0 %391 }
 0x21f   :  { %v395_v4 = vpop.xlane.xlu1 %394 }
 0x221   :  { %v403_v8 = vpop.permute.xlu0 %402 }
 0x222   :  { %v413_v9 = vmul.f32 %v403_v8, %v392_v2 }
 0x223   :  { %v410_v12 = vpop.permute.xlu1 %409 }
 0x224   :  { %v414_v13 = vmul.f32 %v410_v12, %v395_v4  ;;  %417 = vperm.xlu0 %663, %v413_v9  }
 0x226   :  { %422 = vperm.xlu1 %664, %v414_v13  }
 0x2a3   :  { %v418_v6 = vpop.permute.xlu0 %417 }
 0x2a4   :  { %v425_v15 = vmul.f32 %v418_v6, %v796_v10 }
 0x2a5   :  { %v423_v16 = vpop.permute.xlu1 %422 }
 0x2a6   :  { %v427_v17 = vsel %vm58_vm1, %v425_v15, 0.0  ;;  %v426_v18 = vmul.f32 %v423_v16, %v801_v11 }
 0x2a7   :  { %v428_v19 = vrot.slane %v427_v17, 4 }
 0x2a8   :  { %v434_v20 = vsel %vm58_vm1, %v426_v18, 0.0 }
 0x2a9   :  { %v429_v21 = vadd.f32 %v428_v19, %v427_v17  ;;  %v435_v22 = vrot.slane %v434_v20, 4 }
 0x2ab   :  { %v430_v23 = vrot.slane %v429_v21, 2  ;;  %v436_v7 = vadd.f32 %v435_v22, %v434_v20 }
 0x2ad   :  { %v431_v24 = vadd.f32 %v430_v23, %v429_v21  ;;  %v437_v25 = vrot.slane %v436_v7, 2 }
 0x2af   :  { %v432_v26 = vrot.slane %v431_v24, 1  ;;  %v438_v27 = vadd.f32 %v437_v25, %v436_v7 }
 0x2b1   :  { %v433_v28 = vadd.f32 %v432_v26, %v431_v24  ;;  %v439_v29 = vrot.slane %v438_v27, 1 }
 0x2b3   :  { %v441_v10 = vadd.f32 %v433_v28, %v842_v48  ;;  %v440_v30 = vadd.f32 %v439_v29, %v438_v27  ;;  %v684_v48 = vpop.eup %683 }
 0x2b5   :  { %v443_v31 = vpack.c.bf16 %v441_v10, %v441_v10  ;;  %v442_v32 = vadd.f32 %v440_v30, %v846_v56 }
 0x2b7   :  { %v444_v11 = vpack.c.bf16 %v442_v32, %v442_v32  ;;  %v451_v33 = vunpack.c.l.b16 %v443_v31 }
 0x2b9   :  { %v452_v34 = vunpack.c.l.b16 %v444_v11 }
 0x2bb   :  { %v453_v35 = vsel %vm174_vm2, %v452_v34, %v451_v33 }
 0x2bc   :  { %v454_v36 = vpack.c.b16 %v453_v35, %v453_v35 }
 0x2be   :  { %647 = vmatmul.mubr.msk.bf16.vlgmr.msra.gmra.mrb[4].mxu1 %vm58_vm1, %v454_v36 }
 0x391   :  { %v504_v3 = vpop.f32.mrb[4].mxu1 }
 0x392   :  { %685 = vtanh.f32 %v504_v3  ;;  %v648_v37 = vpop.f32.mrb[5].mxu1 }
 0x393   :  { %v507_v38 = vpop.f32.mrb[6].mxu1 }
 0x394   :  { %v649_v40 = vpop.f32.mrb[7].mxu1 }
 0x39c   :  { %v686_v41 = vpop.eup %685 }
 0x39d   :  { %v568_v56 = vmul.f32 %v686_v41, %v684_v48 }
 0x39f   :  { %570 = vst.msk [vmem:[#allocation2] sm:$0x3] %vm569_vm3, %v568_v56 }
 0x3a0   :  { %698 = shalt.err (!%p695_p4)
}
 0x3a1   :  { %s699_s3 = scalar_lea.hbm %s921_s10, 32 }
 0x3a2   :  { %p700_p5 = scmp.ne.s32.totalorder %s921_s10, %s699_s3  ;;  %p703_p6 = scmp.lt.u32.totalorder %s699_s3, %s921_s10 }
 0x3a4   :  { %p705_p7 = pnand %p703_p6, %p700_p5 }
 0x3a6   :  { %708 = shalt.err (!%p705_p7)
}
 0x3a7   :  { %580 = dma.vmem_to_hbm [thread:$0]  %s578_s16, 32, %s921_s10, [#allocation3]  }
 0x3a8   :  { %709 = dma.done.wait [#allocation3], 32  }
 0x3a9   :  { %710 = vsyncadd [#allocation3], 4294967264 }
 0x3aa   :  { %584 = vsyncpa [#allocation3], 1 }

</bundles_post_ra>
